<compile_context>
chip_gen: v5e
topology: v5e:2x2
jax: 0.10.0
libtpu: 0.0.40
codegen_flags: <defaults>
</compile_context>

<pallas_src>
import jax
import jax.numpy as jnp
from jax.experimental import pallas as pl
from jax.experimental.pallas import tpu as pltpu


def _round_up(x, m):
    return ((x + m - 1) // m) * m


def _vmem_budget_bytes():
    """Per-generation scoped-VMEM limit + per-buffer weight-tile budget."""
    try:
        phys = int(pltpu.get_tpu_info().vmem_capacity_bytes)
    except Exception:
        phys = 64 << 20  # conservative fallback (v7x-sized VMEM)
    # Scoped limit: ~3/4 of physical (96 MiB on v5e/v6e, 48 MiB on v7x).
    vmem_limit = int(min((phys * 3) // 4, 96 << 20))
    # The W tile dominates: it is double-buffered and its f32 product temp can
    # be another tile-sized buffer, so give each W buffer ~1/4 of the limit.
    w_buf_budget = vmem_limit // 4
    return vmem_limit, w_buf_budget


def _choose_tiling(M, in_f, out_f, w_buf_budget):
    """Static tile sizes.  Uses M (max batch) so the padded parameter layout
    is call-independent; calls with B <= M only use less VMEM/bandwidth."""
    in_f_min = _round_up(in_f, 8)        # f32 sublane packing
    out_f_p = _round_up(out_f, 128)      # lane-dense output columns

    # tn: largest multiple of 128 that exactly divides out_f_p (no padded
    # weight columns are streamed), capped at 512, and leaving >= 2 parallel
    # N steps when out_f allows it (v7x has 2 TensorCores and only the
    # parallel axis is sharded across them).
    cap = min(512, out_f_p if out_f_p < 256 else out_f_p // 2)
    tn = 128
    for cand in range(256, cap + 1, 128):
        if out_f_p % cand == 0:
            tn = cand
    n_tiles = out_f_p // tn

    # tk: largest reduction chunk (multiple of 8) whose W tile fits the
    # per-buffer VMEM budget; if the full reduction does not fit, tile K.
    per_k_bytes = M * tn * 4             # one K row of a W tile, f32
    tk_max = max(8, (w_buf_budget // per_k_bytes) // 8 * 8)
    if tk_max >= in_f_min:
        tk, k_tiles = in_f_min, 1
    else:
        k_tiles = -(-in_f_min // tk_max)
        tk = _round_up(-(-in_f_min // k_tiles), 8)
    in_f_p = k_tiles * tk
    return in_f_p, out_f_p, tk, tn, k_tiles, n_tiles


def prepare_expanded_linear_params(weight_t, bias, max_batch_size):
    """One-time (init-time) parameter layout: pad to lane/sublane-dense shapes
    and fix the tiling.  Do NOT call this per forward pass.

    weight_t: (M, in_f, out_f)   per-slot weight, pre-transposed to (in, out)
    bias:     (M, out_f)
    returns   (w_padded (M, in_f_p, out_f_p), b_padded (M, out_f_p), cfg)
    """
    M, in_f, out_f = weight_t.shape
    assert M == max_batch_size and bias.shape == (M, out_f)

    vmem_limit, w_buf_budget = _vmem_budget_bytes()
    in_f_p, out_f_p, tk, tn, k_tiles, n_tiles = _choose_tiling(
        M, in_f, out_f, w_buf_budget)

    # Zero padding is exact: padded in_f rows contribute 0, padded out_f
    # columns are sliced off after the kernel.
    w_p = jnp.pad(weight_t, ((0, 0), (0, in_f_p - in_f), (0, out_f_p - out_f)))
    b_p = jnp.pad(bias, ((0, 0), (0, out_f_p - out_f)))

    cfg = dict(max_batch_size=M, in_f=in_f, out_f=out_f,
               in_f_p=in_f_p, out_f_p=out_f_p,
               tk=tk, tn=tn, k_tiles=k_tiles, n_tiles=n_tiles,
               vmem_limit=vmem_limit)
    return w_p, b_p, cfg


def _expanded_linear_kernel(x_ref, w_ref, b_ref, o_ref, acc_ref):
    # Grid: (N tiles [parallel], K tiles [arbitrary / reduction]).
    # x_ref: (B, tk, 1)    w_ref: (B, tk, tn)    b_ref: (M, tn)
    # o_ref: (B, tn)       acc_ref: (B, tn) f32 VMEM scratch
    k = pl.program_id(1)

    @pl.when(k == 0)
    def _():
        acc_ref[...] = jnp.zeros_like(acc_ref)

    x = x_ref[...].astype(jnp.float32)            # (B, tk, 1)
    w = w_ref[...].astype(jnp.float32)            # (B, tk, tn)
    # Per-slot row-vector @ matrix as lane-broadcast multiply + sublane reduce
    # (VPU + XLU) instead of B tiny (1 x tk) MXU matmuls.
    acc_ref[...] += jnp.sum(x * w, axis=1)        # (B, tn), f32 accumulate

    @pl.when(k == pl.num_programs(1) - 1)
    def _():
        b_live = o_ref.shape[0]                   # static: live batch slots
        bias = b_ref[0:b_live, :].astype(jnp.float32)
        o_ref[...] = (acc_ref[...] + bias).astype(o_ref.dtype)


def expanded_linear(x, w_padded, b_padded, cfg):
    """Per-batch-slot linear: y[b] = x[b] @ W[b] + bias[b] for b < batch.

    x:        (B, in_f)                               (B <= max_batch_size)
    w_padded: (M, in_f_p, out_f_p)   from prepare_expanded_linear_params
    b_padded: (M, out_f_p)
    returns   (B, out_f)
    """
    B, in_f = x.shape
    M = cfg["max_batch_size"]
    assert B <= M and in_f == cfg["in_f"]
    in_f_p, out_f_p = cfg["in_f_p"], cfg["out_f_p"]
    tk, tn = cfg["tk"], cfg["tn"]
    k_tiles, n_tiles = cfg["k_tiles"], cfg["n_tiles"]

    # Per-call x padding is tiny (B x in_f); all weight/bias layout work was
    # hoisted to prepare_expanded_linear_params.  x laid out as (B, in_f_p, 1)
    # so in_f sits on sublanes and the in-kernel broadcast against W is a
    # native lane broadcast.
    x3 = jnp.pad(x, ((0, 0), (0, in_f_p - in_f))).reshape(B, in_f_p, 1)

    cost = pl.CostEstimate(
        flops=2 * B * in_f_p * out_f_p,
        transcendentals=0,
        bytes_accessed=4 * (B * in_f_p * out_f_p      # streamed W slots
                            + B * in_f_p              # x
                            + M * out_f_p             # bias
                            + B * out_f_p))           # output

    out = pl.pallas_call(
        _expanded_linear_kernel,
        out_shape=jax.ShapeDtypeStruct((B, out_f_p), x.dtype),
        grid_spec=pltpu.PrefetchScalarGridSpec(
            num_scalar_prefetch=0,
            grid=(n_tiles, k_tiles),                  # reduction axis last
            in_specs=[
                # x chunk: all live slots, K chunk k.
                pl.BlockSpec((B, tk, 1), lambda n, k: (0, k, 0)),
                # W tile: leading (slot) dim has no (8,128) constraint, so a
                # block of B < M slots streams only the live slots of the full
                # padded parameter array -> no per-call slice copy.
                pl.BlockSpec((B, tk, tn), lambda n, k: (0, k, n)),
                # bias tile: full slot dim (tiny); kernel uses first B rows.
                pl.BlockSpec((M, tn), lambda n, k: (0, n)),
            ],
            out_specs=pl.BlockSpec((B, tn), lambda n, k: (0, n)),
            scratch_shapes=[pltpu.VMEM((B, tn), jnp.float32)],
        ),
        compiler_params=pltpu.CompilerParams(
            dimension_semantics=("parallel", "arbitrary"),
            vmem_limit_bytes=cfg["vmem_limit"]),
        cost_estimate=cost,
    )(x3, w_padded, b_padded)
    return out[:, :cfg["out_f"]]


if __name__ == "__main__":
    in_features = 32
    out_features = 32
    max_batch_size = 4
    batch = 2

    key = jax.random.PRNGKey(0)
    kw, kb, kx = jax.random.split(key, 3)

    # PyTorch Conv1d default init: U(-1/sqrt(fan_in), 1/sqrt(fan_in)),
    # fan_in = (in_channels / groups) * kernel_size = in_features * 1.
    bound = 1.0 / (in_features ** 0.5)
    conv_w = jax.random.uniform(
        kw, (max_batch_size * out_features, in_features, 1),
        minval=-bound, maxval=bound, dtype=jnp.float32)
    conv_b = jax.random.uniform(
        kb, (max_batch_size * out_features,),
        minval=-bound, maxval=bound, dtype=jnp.float32)

    # (M*out, in, 1) -> (M, out, in) -> pre-transpose to (M, in, out).
    W = conv_w[..., 0].reshape(max_batch_size, out_features, in_features)
    W_t = jnp.transpose(W, (0, 2, 1))
    bias = conv_b.reshape(max_batch_size, out_features)

    # One-time parameter layout (padding + tiling), hoisted out of the
    # per-call path.
    w_p, b_p, cfg = prepare_expanded_linear_params(W_t, bias, max_batch_size)

    x = jax.random.normal(kx, (batch, in_features), dtype=jnp.float32)

    y = expanded_linear(x, w_p, b_p, cfg)
    y = jax.block_until_ready(y)

    # Pure-JAX reference of the PyTorch semantics (per-slot linear, b < batch).
    y_ref = jnp.einsum("bi,bio->bo", x, W_t[:batch]) + bias[:batch]
    assert y.shape == (batch, out_features)
    assert jnp.allclose(y, y_ref, atol=1e-5, rtol=1e-5)

    print("KERNEL_OK")
</pallas_src>

<mosaic_0001>
module attributes {stable_mosaic.version = 11 : i64} {
  func.func @_expanded_linear_kernel(%arg0: i32, %arg1: i32, %arg2: memref<2x32x1xf32, #tpu.memory_space<vmem>>, %arg3: memref<2x32x128xf32, #tpu.memory_space<vmem>>, %arg4: memref<4x128xf32, #tpu.memory_space<vmem>>, %arg5: memref<2x128xf32, #tpu.memory_space<vmem>>, %arg6: memref<2x128xf32, #tpu.memory_space<vmem>>) attributes {dimension_semantics = [#tpu.dimension_semantics<parallel>, #tpu.dimension_semantics<arbitrary>], iteration_bounds = array<i64: 1, 1>, scalar_prefetch = 0 : i64, scratch_operands = 1 : i64, tpu.core_type = #tpu.core_type<tc>, window_params = [{transform_indices = @transform_0, window_bounds = array<i64: 2, 32, 1>}, {transform_indices = @transform_1, window_bounds = array<i64: 2, 32, 128>}, {transform_indices = @transform_2, window_bounds = array<i64: 4, 128>}, {transform_indices = @transform_3, window_bounds = array<i64: 2, 128>}]} {
    %c0_i32 = arith.constant 0 : i32
    %0 = arith.cmpi eq, %arg1, %c0_i32 : i32
    %1 = arith.extui %0 : i1 to i32
    %c0_i32_0 = arith.constant 0 : i32
    %2 = arith.cmpi ne, %1, %c0_i32_0 : i32
    scf.if %2 {
      %cst_12 = arith.constant 0.000000e+00 : f32
      %14 = vector.broadcast %cst_12 : f32 to vector<2x128xf32>
      %c0_13 = arith.constant 0 : index
      %c0_14 = arith.constant 0 : index
      %15 = vector.load %arg6[%c0_13, %c0_14] : memref<2x128xf32, #tpu.memory_space<vmem>>, vector<2x128xf32>
      tpu.vector_store %arg6[%c0_13, %c0_14], %14 {strides = array<i32>} : memref<2x128xf32, #tpu.memory_space<vmem>>, vector<2x128xf32>,
    } else {
    }
    %c0 = arith.constant 0 : index
    %c0_1 = arith.constant 0 : index
    %c0_2 = arith.constant 0 : index
    %3 = vector.load %arg2[%c0, %c0_1, %c0_2] : memref<2x32x1xf32, #tpu.memory_space<vmem>>, vector<2x32x1xf32>
    %c0_3 = arith.constant 0 : index
    %c0_4 = arith.constant 0 : index
    %c0_5 = arith.constant 0 : index
    %4 = vector.load %arg3[%c0_3, %c0_4, %c0_5] : memref<2x32x128xf32, #tpu.memory_space<vmem>>, vector<2x32x128xf32>
    %c0_6 = arith.constant 0 : index
    %c0_7 = arith.constant 0 : index
    %5 = vector.load %arg6[%c0_6, %c0_7] : memref<2x128xf32, #tpu.memory_space<vmem>>, vector<2x128xf32>
    %6 = vector.broadcast %3 : vector<2x32x1xf32> to vector<2x32x128xf32>
    %7 = arith.mulf %6, %4 : vector<2x32x128xf32>
    %cst = arith.constant dense<0.000000e+00> : vector<2x128xf32>
    %8 = vector.multi_reduction <add>, %7, %cst [1] : vector<2x32x128xf32> to vector<2x128xf32>
    %9 = arith.addf %5, %8 : vector<2x128xf32>
    %c0_8 = arith.constant 0 : index
    %c0_9 = arith.constant 0 : index
    %10 = vector.load %arg6[%c0_8, %c0_9] : memref<2x128xf32, #tpu.memory_space<vmem>>, vector<2x128xf32>
    tpu.vector_store %arg6[%c0_8, %c0_9], %9 {strides = array<i32>} : memref<2x128xf32, #tpu.memory_space<vmem>>, vector<2x128xf32>,
    %c0_i32_10 = arith.constant 0 : i32
    %11 = arith.cmpi eq, %arg1, %c0_i32_10 : i32
    %12 = arith.extui %11 : i1 to i32
    %c0_i32_11 = arith.constant 0 : i32
    %13 = arith.cmpi ne, %12, %c0_i32_11 : i32
    scf.if %13 {
      %c0_12 = arith.constant 0 : index
      %c0_13 = arith.constant 0 : index
      %14 = vector.load %arg4[%c0_12, %c0_13] : memref<4x128xf32, #tpu.memory_space<vmem>>, vector<2x128xf32>
      %c0_14 = arith.constant 0 : index
      %c0_15 = arith.constant 0 : index
      %15 = vector.load %arg6[%c0_14, %c0_15] : memref<2x128xf32, #tpu.memory_space<vmem>>, vector<2x128xf32>
      %16 = arith.addf %15, %14 : vector<2x128xf32>
      %c0_16 = arith.constant 0 : index
      %c0_17 = arith.constant 0 : index
      %17 = vector.load %arg5[%c0_16, %c0_17] : memref<2x128xf32, #tpu.memory_space<vmem>>, vector<2x128xf32>
      tpu.vector_store %arg5[%c0_16, %c0_17], %16 {strides = array<i32>} : memref<2x128xf32, #tpu.memory_space<vmem>>, vector<2x128xf32>,
    } else {
    }
    return
  }
  func.func @transform_0(%arg0: i32, %arg1: i32) -> (i32, i32, i32) {
    %c0_i32 = arith.constant 0 : i32
    %c0_i32_0 = arith.constant 0 : i32
    %c0_i32_1 = arith.constant 0 : i32
    return %c0_i32, %arg1, %c0_i32_0 : i32, i32, i32
  }
  func.func @transform_1(%arg0: i32, %arg1: i32) -> (i32, i32, i32) {
    %c0_i32 = arith.constant 0 : i32
    %c0_i32_0 = arith.constant 0 : i32
    return %c0_i32, %arg1, %arg0 : i32, i32, i32
  }
  func.func @transform_2(%arg0: i32, %arg1: i32) -> (i32, i32) {
    %c0_i32 = arith.constant 0 : i32
    %c0_i32_0 = arith.constant 0 : i32
    return %c0_i32, %arg0 : i32, i32
  }
  func.func @transform_3(%arg0: i32, %arg1: i32) -> (i32, i32) {
    %c0_i32 = arith.constant 0 : i32
    %c0_i32_0 = arith.constant 0 : i32
    return %c0_i32, %arg0 : i32, i32
  }
}

</mosaic_0001>

<bundles_post_ra>
// kernel: tpu_custom_call.1
= control target key start
LH: loop header
LB: loop body
LE: loop exit
PB: predicated region body
PF: predicated region fallthrough
CT: control target
= control target key end

     0   :  { %8 = vsyncpa [#allocation4], 0  ;;  %s270_s0 = inlined_call_operand.vmem [shape: f32[2,32,1], index: 0, kind: input, shape index: {}]   ;;  %s271_s1 = inlined_call_operand.hbm [shape: f32[4,32,128], index: 1, kind: input, shape index: {}]   ;;  %s272_s2 = inlined_call_operand.vmem [shape: f32[4,128], index: 2, kind: input, shape index: {}]   ;;  %s273_s3 = inlined_call_operand.hbm [shape: f32[2,128], index: 3, kind: output, shape index: {}]  }
   0x1   :  { %9 = vsyncpa [#allocation5], 0  ;;  %s16_s14 = sshll.u32 %s271_s1, 4  ;;  %s211_s15 = smov [#allocation3]   ;;  %s17_s14 = int_to_ptr.hbm [resolvable:$true] %s16_s14 }
   0x2   :  { %s18_s16 = sshll.u32 %s211_s15, 4  ;;  %s212_s17 = smov 128   ;;  %s19_s16 = int_to_ptr.vmem [resolvable:$true] %s18_s16 }
   0x3   :  { %s213_s18 = smov 8  }
   0x4   :  { %24 = dma.hbm_to_vmem [thread:$0]  %s17_s14, 1024, %s19_s16, [#allocation4], %s212_s17, %s212_s17, %s213_s18  }
   0x5   :  { %207 = dma.done.wait [#allocation4], 1024  }
   0x6   :  { %208 = vsyncadd [#allocation4], 4294966272  ;;  %v214_v0 = vmov 0   ;;  %v40_v1 = vld [vmem:[%s270_s0 + $0x20] sm:$0xff]  ;;  %v38_v3 = vld [vmem:[%s270_s0 + $0x10] sm:$0xff]  ;;  %v215_v9 = vmov 0.0  }
   0x7   :  { %157 = vset.pattern.permute.xlu1 %v214_v0  ;;  %156 = vset.pattern.permute.xlu0 %v214_v0  ;;  %v36_v2 = vld [vmem:[%s270_s0] sm:$0xff]  ;;  %v41_v4 = vld [vmem:[%s270_s0 + $0x28] sm:$0xff]  ;;  %v42_v6 = vld [vmem:[%s270_s0 + $0x30] sm:$0xff]  ;;  %35 = vst [vmem:[#allocation2] sm:$0x3] %v215_v9  ;;  %vm121_vm0 = vcmask 1041409  }
   0x8   :  { %158 = vset.pattern.permute.xlu2 %v214_v0  ;;  %75 = vperm.xlu1 %157, %v40_v1   ;;  %v37_v5 = vld [vmem:[%s270_s0 + $0x8] sm:$0xff]  ;;  %v43_v7 = vld [vmem:[%s270_s0 + $0x38] sm:$0xff]  ;;  %v129_v55 = vld [vmem:[%s272_s2] sm:$0x3]  ;;  %s216_s8 = smov [#allocation6]   ;;  %s140_s12 = sshll.u32 %s273_s3, 4  ;;  %s141_s12 = int_to_ptr.hbm [resolvable:$true] %s140_s12 }
   0x9   :  { %55 = vperm.xlu0 %156, %v36_v2   ;;  %65 = vperm.xlu2 %158, %v38_v3   ;;  %v39_v8 = vld [vmem:[%s270_s0 + $0x18] sm:$0xff]  ;;  %v49_v13 = vld [vmem:[#allocation3 + $0x28] sm:$0xff]  ;;  %v48_v15 = vld [vmem:[#allocation3 + $0x20] sm:$0xff]  ;;  %s138_s9 = sshll.u32 %s216_s8, 4  ;;  %s139_s9 = int_to_ptr.vmem [resolvable:$true] %s138_s9 }
   0xa   :  { %v45_v14 = vld [vmem:[#allocation3 + $0x8] sm:$0xff]  ;;  %v44_v16 = vld [vmem:[#allocation3] sm:$0xff]  ;;  %v46_v23 = vld [vmem:[#allocation3 + $0x10] sm:$0xff] }
   0xb   :  { %v50_v24 = vld [vmem:[#allocation3 + $0x30] sm:$0xff]  ;;  %v51_v28 = vld [vmem:[#allocation3 + $0x38] sm:$0xff] }
   0xc   :  { %v47_v29 = vld [vmem:[#allocation3 + $0x18] sm:$0xff] }
   0xe   :  { %v52_v51 = vld [vmem:[#allocation2] sm:$0x3] }
  0x10   :  { %80 = vperm.xlu1 %157, %v41_v4  }
  0x11   :  { %60 = vperm.xlu0 %156, %v37_v5   ;;  %85 = vperm.xlu2 %158, %v42_v6  }
  0x18   :  { %90 = vperm.xlu1 %157, %v43_v7  }
  0x19   :  { %70 = vperm.xlu0 %156, %v39_v8  }
  0x63   :  { %v66_v12 = vpop.permute.xlu2 %65 }
  0x64   :  { %v95_v30 = vmul.f32 %v66_v12, %v46_v23 }
  0x6b   :  { %v86_v25 = vpop.permute.xlu2 %85 }
  0x6c   :  { %v99_v31 = vmul.f32 %v86_v25, %v50_v24 }
  0x7a   :  { %v76_v10 = vpop.permute.xlu1 %75 }
  0x7b   :  { %v56_v11 = vpop.permute.xlu0 %55  ;;  %v97_v21 = vmul.f32 %v76_v10, %v48_v15 }
  0x7c   :  { %v93_v22 = vmul.f32 %v56_v11, %v44_v16 }
  0x82   :  { %v81_v17 = vpop.permute.xlu1 %80 }
  0x83   :  { %v61_v18 = vpop.permute.xlu0 %60  ;;  %v98_v19 = vmul.f32 %v81_v17, %v49_v13 }
  0x84   :  { %v94_v20 = vmul.f32 %v61_v18, %v45_v14 }
  0x85   :  { %v110_v26 = vadd.f32 %v98_v19, %v97_v21 }
  0x86   :  { %v101_v27 = vadd.f32 %v94_v20, %v93_v22 }
  0x87   :  { %v111_v35 = vadd.f32 %v110_v26, %v99_v31 }
  0x88   :  { %v102_v36 = vadd.f32 %v101_v27, %v95_v30 }
  0x8a   :  { %v91_v32 = vpop.permute.xlu1 %90 }
  0x8b   :  { %v71_v33 = vpop.permute.xlu0 %70  ;;  %v100_v34 = vmul.f32 %v91_v32, %v51_v28 }
  0x8c   :  { %v96_v37 = vmul.f32 %v71_v33, %v47_v29 }
  0x8d   :  { %v112_v38 = vadd.f32 %v111_v35, %v100_v34 }
  0x8e   :  { %v103_v39 = vadd.f32 %v102_v36, %v96_v37 }
  0x8f   :  { %v113_v40 = vrot.slane %v112_v38, 4 }
  0x90   :  { %v104_v41 = vrot.slane %v103_v39, 4 }
  0x91   :  { %v114_v42 = vadd.f32 %v113_v40, %v112_v38 }
  0x92   :  { %v105_v43 = vadd.f32 %v104_v41, %v103_v39 }
  0x93   :  { %v115_v44 = vrot.slane %v114_v42, 2 }
  0x94   :  { %v106_v45 = vrot.slane %v105_v43, 2 }
  0x95   :  { %v116_v46 = vadd.f32 %v115_v44, %v114_v42 }
  0x96   :  { %v107_v47 = vadd.f32 %v106_v45, %v105_v43 }
  0x97   :  { %v117_v48 = vrot.slane %v116_v46, 1 }
  0x98   :  { %v108_v49 = vrot.slane %v107_v47, 1 }
  0x99   :  { %v118_v50 = vadd.f32 %v117_v48, %v116_v46 }
  0x9a   :  { %v109_v52 = vadd.f32 %v108_v49, %v107_v47 }
  0x9c   :  { %v122_v53 = vsel %vm121_vm0, %v118_v50, %v109_v52 }
  0x9d   :  { %v124_v54 = vadd.f32 %v122_v53, %v52_v51 }
  0x9f   :  { %125 = vst [vmem:[#allocation2] sm:$0x3] %v124_v54 }
  0xa6   :  { %v130_v56 = vld [vmem:[#allocation2] sm:$0x3] }
  0xa7   :  { %v131_v57 = vadd.f32 %v130_v56, %v129_v55 }
  0xa9   :  { %132 = vst [vmem:[#allocation6] sm:$0x3] %v131_v57 }
  0xaa   :  { %143 = dma.vmem_to_hbm [thread:$0]  %s139_s9, 32, %s141_s12, [#allocation5]  }
  0xab   :  { %209 = dma.done.wait [#allocation5], 32  }
  0xac   :  { %210 = vsyncadd [#allocation5], 4294967264 }
  0xad   :  { %148 = vsyncpa [#allocation4], 1 }
  0xae   :  { %149 = vsyncpa [#allocation5], 1 }

</bundles_post_ra>
